<compile_context>
chip_gen: v7x
topology: tpu7x:2x2x1
jax: 0.10.0
libtpu: 0.0.40
codegen_flags: <defaults>
</compile_context>

<pallas_src>
import functools

import jax
import jax.numpy as jnp
from jax.experimental import pallas as pl
from jax.experimental.pallas import tpu as pltpu

INV_SQRT2 = 0.7071067811865476  # 1/sqrt(2)
_VMEM_SLACK = 2 * 1024 * 1024   # headroom for compiler scratch / semaphores / descriptors


# ----------------------------------------------------------------------------- kernels
def _gelu(h, approximate):
    if approximate:
        # tanh approximation (cheaper on the VALU/EUP); off by default to match nn.GELU.
        c0 = 0.7978845608028654  # sqrt(2/pi)
        return 0.5 * h * (1.0 + jnp.tanh(c0 * (h + 0.044715 * h * h * h)))
    # exact erf formulation == PyTorch nn.GELU default
    return 0.5 * h * (1.0 + jax.lax.erf(h * INV_SQRT2))


def _mlp_kernel_resident(x_ref, w1_ref, b1_ref, w2_ref, b2_ref, o_ref, *,
                         gelu_dtype, approximate):
    # fc1: LHS cast to the weight dtype (native-rate MXU), f32 accumulation.
    x = x_ref[...].astype(w1_ref.dtype)
    h = jnp.dot(x, w1_ref[...], preferred_element_type=jnp.float32)
    h = h + b1_ref[...].astype(jnp.float32)
    # GELU in bf16 on chips with bf16 VPU/EUP, f32 otherwise. dropout(p=0) is identity.
    h = _gelu(h.astype(gelu_dtype), approximate)
    # fc2
    h = h.astype(w2_ref.dtype)
    o = jnp.dot(h, w2_ref[...], preferred_element_type=jnp.float32)
    o = o + b2_ref[...].astype(jnp.float32)
    o_ref[...] = o.astype(o_ref.dtype)


def _mlp_kernel_ktiled(x_ref, w1_ref, b1_ref, w2_ref, b2_ref, o_ref, acc_ref, *,
                       gelu_dtype, approximate):
    # Hidden dimension streamed in chunks of tk; partial fc2 results accumulate in f32.
    k = pl.program_id(1)

    @pl.when(k == 0)
    def _():
        acc_ref[...] = jnp.zeros_like(acc_ref)

    x = x_ref[...].astype(w1_ref.dtype)
    h = jnp.dot(x, w1_ref[...], preferred_element_type=jnp.float32)
    h = h + b1_ref[...].astype(jnp.float32)
    h = _gelu(h.astype(gelu_dtype), approximate)
    h = h.astype(w2_ref.dtype)
    acc_ref[...] += jnp.dot(h, w2_ref[...], preferred_element_type=jnp.float32)

    @pl.when(k == pl.num_programs(1) - 1)
    def _():
        o_ref[...] = (acc_ref[...] + b2_ref[...].astype(jnp.float32)).astype(o_ref.dtype)


# ----------------------------------------------------------------------------- planning
def _round_up(x, mult):
    return ((x + mult - 1) // mult) * mult


def _row_multiple(dtype):
    # sublane packing: f32 -> 8 rows, bf16/f16 -> 16, int8/fp8 -> 32
    return {4: 8, 2: 16, 1: 32}.get(jnp.dtype(dtype).itemsize, 8)


def _vmem_usable_bytes():
    cap = 64 * 1024 * 1024  # conservative default = v7x per-core VMEM
    try:
        info = pltpu.get_tpu_info()
        cap = int(getattr(info, "vmem_capacity_bytes", cap))
    except Exception:
        pass
    # ~13/16 usable: ~52 MiB on a 64 MiB v7x core, ~104 MiB on 128 MiB v5e/v6e.
    return (cap * 13) // 16


def _has_bf16_vector_units():
    try:
        kind = jax.devices()[0].device_kind.lower()
    except Exception:
        return False
    # v5e and earlier have no bf16 VALU/EUP; keep elementwise math in f32 there.
    return not any(tag in kind for tag in ("v2", "v3", "v4", "v5"))


def _per_row_bytes_resident(d_in, d_hidden, d_out_p, x_item, w_item):
    io = 2 * (d_in + d_out_p) * x_item          # double-buffered input/output tiles
    tmp = d_in * w_item                         # fc1 LHS cast copy
    tmp += 3 * d_hidden * 4                     # fc1 f32 result + GELU temporaries
    tmp += d_hidden * w_item                    # cast activations for fc2
    tmp += d_out_p * 4                          # fc2 f32 result
    return io + tmp


def _per_row_bytes_ktiled(d_in, tk, d_out_p, x_item, w_item):
    io = 2 * (d_in + d_out_p) * x_item          # double-buffered input/output tiles
    tmp = d_in * w_item                         # fc1 LHS cast copy
    tmp += 3 * tk * 4 + tk * w_item             # fc1 chunk f32 + GELU temps + cast copy
    tmp += 2 * d_out_p * 4                      # f32 accumulator scratch + partial result
    return io + tmp


def _ktiled_fixed_bytes(d_in, tk, d_out_p, w_item):
    # double-buffered streamed w1/b1/w2 chunks + single-buffered b2
    return 2 * (d_in + d_out_p + 1) * tk * w_item + d_out_p * w_item


def _choose_tk(d_in, d_hidden, d_out_p, x_item, w_item, usable):
    budget = usable - _VMEM_SLACK
    tm_assumed = 256
    fixed = d_out_p * w_item
    fixed += tm_assumed * (2 * (d_in + d_out_p) * x_item + d_in * w_item + 2 * d_out_p * 4)
    per_tk = 2 * (d_in + d_out_p + 1) * w_item + tm_assumed * (3 * 4 + w_item)
    tk = (budget - fixed) // max(per_tk, 1)
    tk = max(128, (tk // 128) * 128)
    # TODO(synk): also tile d_in / d_out for models where even a single 128-wide hidden
    # chunk plus the in/out row tiles exceed the per-core VMEM budget.
    return int(min(tk, _round_up(d_hidden, 128)))


def prepare_mlp_params(w1, b1, w2, b2, *, x_dtype=None, tk=None):
    """One-time parameter prep (hoisted out of the per-call path): pad d_out to a multiple
    of 128 for lane-dense stores, reshape biases to (1, D), decide whether the hidden
    dimension must be streamed (tk) and pad it accordingly."""
    d_in, d_hidden = w1.shape
    d_out = w2.shape[1]
    x_dtype = jnp.dtype(x_dtype) if x_dtype is not None else jnp.dtype(w1.dtype)
    x_item = x_dtype.itemsize
    w_item = jnp.dtype(w1.dtype).itemsize

    d_out_p = _round_up(d_out, 128)
    if d_out_p != d_out:
        w2 = jnp.pad(w2, ((0, 0), (0, d_out_p - d_out)))
        b2 = jnp.pad(b2, ((0, d_out_p - d_out),))

    usable = _vmem_usable_bytes()
    row_mult = _row_multiple(x_dtype)

    resident_bytes = (d_in * d_hidden + d_hidden * d_out_p + d_hidden + d_out_p) * w_item
    per_row = _per_row_bytes_resident(d_in, d_hidden, d_out_p, x_item, w_item)
    fits_resident = resident_bytes + row_mult * per_row + _VMEM_SLACK <= usable

    d_hidden_p = d_hidden
    if tk is None and not fits_resident:
        tk = _choose_tk(d_in, d_hidden, d_out_p, x_item, w_item, usable)
    if tk is not None:
        tk = min(_round_up(int(tk), 128), _round_up(d_hidden, 128))
        d_hidden_p = _round_up(d_hidden, tk)
        if d_hidden_p != d_hidden:
            # zero-padded hidden units contribute exactly 0 (gelu(0) = 0, zero w2 rows)
            w1 = jnp.pad(w1, ((0, 0), (0, d_hidden_p - d_hidden)))
            b1 = jnp.pad(b1, ((0, d_hidden_p - d_hidden),))
            w2 = jnp.pad(w2, ((0, d_hidden_p - d_hidden), (0, 0)))

    return {
        "w1": w1, "b1": b1.reshape(1, d_hidden_p), "w2": w2, "b2": b2.reshape(1, d_out_p),
        "d_in": d_in, "d_hidden_p": d_hidden_p, "d_out": d_out, "d_out_p": d_out_p,
        "tk": tk, "usable_vmem": usable,
    }


# ----------------------------------------------------------------------------- wrapper
def mlp_pallas(x, params, *, tm=None, approximate_gelu=False, gelu_dtype=None):
    """x: [..., d_in] -> [..., d_out]. Fused Linear-GELU-Linear (dropout p=0 is identity)."""
    w1, b1, w2, b2 = params["w1"], params["b1"], params["w2"], params["b2"]
    d_in, d_hidden_p = params["d_in"], params["d_hidden_p"]
    d_out, d_out_p = params["d_out"], params["d_out_p"]
    tk = params["tk"]
    usable = params["usable_vmem"]

    orig_shape = x.shape
    assert orig_shape[-1] == d_in
    x2 = x.reshape(-1, d_in)
    m = x2.shape[0]
    x_item = jnp.dtype(x.dtype).itemsize
    w_item = jnp.dtype(w1.dtype).itemsize
    row_mult = _row_multiple(x.dtype)

    if gelu_dtype is None:
        if jnp.dtype(w1.dtype) == jnp.bfloat16 and _has_bf16_vector_units():
            gelu_dtype = jnp.bfloat16   # 2 elems/lane on the v6e/v7x VPU/EUP
        else:
            gelu_dtype = jnp.float32    # v5e has no bf16 VALU/EUP; f32 models stay f32

    # ---- row tile derived from the remaining VMEM budget -----------------------------
    if tm is None:
        if tk is None:
            w_bytes = (d_in * d_hidden_p + d_hidden_p * d_out_p
                       + d_hidden_p + d_out_p) * w_item        # single-buffered residents
            per_row = _per_row_bytes_resident(d_in, d_hidden_p, d_out_p, x_item, w_item)
            budget = usable - _VMEM_SLACK - w_bytes
        else:
            per_row = _per_row_bytes_ktiled(d_in, tk, d_out_p, x_item, w_item)
            budget = usable - _VMEM_SLACK - _ktiled_fixed_bytes(d_in, tk, d_out_p, w_item)
        tm = max(row_mult, budget // max(per_row, 1))
        tm = min(tm, 512)
        # at least two grid steps so Megacore (v7x: 2 TensorCores) can shard the row axis
        if m > row_mult:
            tm = min(tm, _round_up((m + 1) // 2, row_mult))
        # MXU-friendly rounding (256/128 multiples), else sublane-tile multiple
        if tm >= 256:
            tm = (tm // 256) * 256
        elif tm >= 128:
            tm = 128
        else:
            tm = max(row_mult, (tm // row_mult) * row_mult)
    tm = max(row_mult, _round_up(int(tm), row_mult))

    m_p = _round_up(max(m, tm), tm)
    x2p = jnp.pad(x2, ((0, m_p - m), (0, 0))) if m_p != m else x2

    cost = pl.CostEstimate(
        flops=2 * m_p * (d_in * d_hidden_p + d_hidden_p * d_out_p),
        transcendentals=m_p * d_hidden_p,
        bytes_accessed=m_p * (d_in + d_out_p) * x_item
        + (d_in * d_hidden_p + d_hidden_p * d_out_p + d_hidden_p + d_out_p) * w_item,
    )

    def _call(single_buffer_residents):
        if single_buffer_residents:
            def resident(shape, imap):
                return pl.BlockSpec(shape, imap, pipeline_mode=pl.Buffered(1))
        else:
            def resident(shape, imap):
                return pl.BlockSpec(shape, imap)

        if tk is None:
            grid = (m_p // tm,)
            kernel = functools.partial(_mlp_kernel_resident,
                                       gelu_dtype=gelu_dtype,
                                       approximate=approximate_gelu)
            in_specs = [
                pl.BlockSpec((tm, d_in), lambda i: (i, 0)),
                resident((d_in, d_hidden_p), lambda i: (0, 0)),
                resident((1, d_hidden_p), lambda i: (0, 0)),
                resident((d_hidden_p, d_out_p), lambda i: (0, 0)),
                resident((1, d_out_p), lambda i: (0, 0)),
            ]
            out_specs = pl.BlockSpec((tm, d_out_p), lambda i: (i, 0))
            scratch = []
            dims = ("parallel",)
        else:
            grid = (m_p // tm, d_hidden_p // tk)
            kernel = functools.partial(_mlp_kernel_ktiled,
                                       gelu_dtype=gelu_dtype,
                                       approximate=approximate_gelu)
            in_specs = [
                pl.BlockSpec((tm, d_in), lambda i, k: (i, 0)),
                pl.BlockSpec((d_in, tk), lambda i, k: (0, k)),
                pl.BlockSpec((1, tk), lambda i, k: (0, k)),
                pl.BlockSpec((tk, d_out_p), lambda i, k: (k, 0)),
                resident((1, d_out_p), lambda i, k: (0, 0)),
            ]
            out_specs = pl.BlockSpec((tm, d_out_p), lambda i, k: (i, 0))
            scratch = [pltpu.VMEM((tm, d_out_p), jnp.float32)]
            dims = ("parallel", "arbitrary")

        return pl.pallas_call(
            kernel,
            out_shape=jax.ShapeDtypeStruct((m_p, d_out_p), x.dtype),
            grid_spec=pltpu.PrefetchScalarGridSpec(
                num_scalar_prefetch=0,
                grid=grid,
                in_specs=in_specs,
                out_specs=out_specs,
                scratch_shapes=scratch,
            ),
            compiler_params=pltpu.CompilerParams(
                dimension_semantics=dims,
                vmem_limit_bytes=int(usable),
            ),
            cost_estimate=cost,
        )(x2p, w1, b1, w2, b2)

    try:
        out = _call(True)     # single-buffered resident weights (preferred)
    except Exception:
        out = _call(False)    # fallback if this JAX build rejects pl.Buffered(1)

    out = out[:m, :d_out]
    return out.reshape(*orig_shape[:-1], d_out)


# ----------------------------------------------------------------------------- reference
def mlp_reference(x, w1, b1, w2, b2):
    hp = jax.lax.Precision.HIGHEST
    h = jnp.dot(x, w1, precision=hp) + b1
    h = 0.5 * h * (1.0 + jax.lax.erf(h * INV_SQRT2))
    return jnp.dot(h, w2, precision=hp) + b2


def init_params(key, in_features, hidden_features, out_features, dtype=jnp.float32):
    # Deterministic init mimicking torch.nn.Linear defaults
    # (kaiming-uniform weights, uniform biases with bound 1/sqrt(fan_in)).
    k1, k2, k3, k4 = jax.random.split(key, 4)
    bound1 = 1.0 / (in_features ** 0.5)
    bound2 = 1.0 / (hidden_features ** 0.5)
    w1 = jax.random.uniform(k1, (in_features, hidden_features), dtype, -bound1, bound1)
    b1 = jax.random.uniform(k2, (hidden_features,), dtype, -bound1, bound1)
    w2 = jax.random.uniform(k3, (hidden_features, out_features), dtype, -bound2, bound2)
    b2 = jax.random.uniform(k4, (out_features,), dtype, -bound2, bound2)
    return w1, b1, w2, b2


if __name__ == "__main__":
    key = jax.random.PRNGKey(0)
    kx, kp1, kp2 = jax.random.split(key, 3)

    batch, seq, in_features = 2, 8, 32
    hidden_features = 64
    out_features = in_features  # Mlp default: out_features = in_features

    x = jax.random.normal(kx, (batch, seq, in_features), dtype=jnp.float32)

    # --- Test 1: resident-weights path (weights fit comfortably in VMEM) ---
    w1, b1, w2, b2 = init_params(kp1, in_features, hidden_features, out_features)
    params = prepare_mlp_params(w1, b1, w2, b2, x_dtype=x.dtype)
    y = jax.block_until_ready(mlp_pallas(x, params))
    y_ref = mlp_reference(x, w1, b1, w2, b2)
    assert y.shape == (batch, seq, out_features)
    assert jnp.allclose(y, y_ref, atol=2e-3, rtol=2e-3), "resident path mismatch"

    # --- Test 2: hidden-dim streaming path (forced tk; the large-d_hidden fallback) ---
    hidden2 = 256
    w1b, b1b, w2b, b2b = init_params(kp2, in_features, hidden2, out_features)
    params2 = prepare_mlp_params(w1b, b1b, w2b, b2b, x_dtype=x.dtype, tk=128)
    y2 = jax.block_until_ready(mlp_pallas(x, params2))
    y2_ref = mlp_reference(x, w1b, b1b, w2b, b2b)
    assert y2.shape == (batch, seq, out_features)
    assert jnp.allclose(y2, y2_ref, atol=2e-3, rtol=2e-3), "k-tiled path mismatch"

    print("KERNEL_OK")
</pallas_src>

<mosaic_0001>
module attributes {stable_mosaic.version = 11 : i64} {
  func.func @_mlp_kernel_resident(%arg0: i32, %arg1: memref<8x32xf32, #tpu.memory_space<vmem>>, %arg2: memref<32x64xf32, #tpu.memory_space<vmem>>, %arg3: memref<1x64xf32, #tpu.memory_space<vmem>>, %arg4: memref<64x128xf32, #tpu.memory_space<vmem>>, %arg5: memref<1x128xf32, #tpu.memory_space<vmem>>, %arg6: memref<8x128xf32, #tpu.memory_space<vmem>>) attributes {dimension_semantics = [#tpu.dimension_semantics<parallel>], iteration_bounds = array<i64: 2>, scalar_prefetch = 0 : i64, scratch_operands = 0 : i64, tpu.core_type = #tpu.core_type<tc>, window_params = [{transform_indices = @transform_0, window_bounds = array<i64: 8, 32>}, {pipeline_mode = #tpu.pipeline_mode<synchronous>, transform_indices = @transform_1, window_bounds = array<i64: 32, 64>}, {pipeline_mode = #tpu.pipeline_mode<synchronous>, transform_indices = @transform_2, window_bounds = array<i64: 1, 64>}, {pipeline_mode = #tpu.pipeline_mode<synchronous>, transform_indices = @transform_3, window_bounds = array<i64: 64, 128>}, {pipeline_mode = #tpu.pipeline_mode<synchronous>, transform_indices = @transform_4, window_bounds = array<i64: 1, 128>}, {transform_indices = @transform_5, window_bounds = array<i64: 8, 128>}]} {
    %c0 = arith.constant 0 : index
    %c0_0 = arith.constant 0 : index
    %0 = vector.load %arg1[%c0, %c0_0] : memref<8x32xf32, #tpu.memory_space<vmem>>, vector<8x32xf32>
    %c0_1 = arith.constant 0 : index
    %c0_2 = arith.constant 0 : index
    %1 = vector.load %arg2[%c0_1, %c0_2] : memref<32x64xf32, #tpu.memory_space<vmem>>, vector<32x64xf32>
    %cst = arith.constant dense<0.000000e+00> : vector<8x64xf32>
    %2 = tpu.matmul %0, %1, %cst {dimension_numbers = #tpu.dot_dimension_numbers<[1], [0], [0], [1], [0, 0, 1, 1], [], []>} : vector<8x32xf32>, vector<32x64xf32>, vector<8x64xf32> -> vector<8x64xf32>
    %c0_3 = arith.constant 0 : index
    %c0_4 = arith.constant 0 : index
    %3 = vector.load %arg3[%c0_3, %c0_4] : memref<1x64xf32, #tpu.memory_space<vmem>>, vector<1x64xf32>
    %4 = vector.broadcast %3 : vector<1x64xf32> to vector<8x64xf32>
    %5 = arith.addf %2, %4 : vector<8x64xf32>
    %cst_5 = arith.constant 5.000000e-01 : f32
    %6 = vector.broadcast %cst_5 : f32 to vector<8x64xf32>
    %7 = arith.mulf %6, %5 : vector<8x64xf32>
    %cst_6 = arith.constant 0.707106769 : f32
    %8 = vector.broadcast %cst_6 : f32 to vector<8x64xf32>
    %9 = arith.mulf %5, %8 : vector<8x64xf32>
    %10 = math.erf %9 : vector<8x64xf32>
    %cst_7 = arith.constant 1.000000e+00 : f32
    %11 = vector.broadcast %cst_7 : f32 to vector<8x64xf32>
    %12 = arith.addf %11, %10 : vector<8x64xf32>
    %13 = arith.mulf %7, %12 : vector<8x64xf32>
    %c0_8 = arith.constant 0 : index
    %c0_9 = arith.constant 0 : index
    %14 = vector.load %arg4[%c0_8, %c0_9] : memref<64x128xf32, #tpu.memory_space<vmem>>, vector<64x128xf32>
    %cst_10 = arith.constant dense<0.000000e+00> : vector<8x128xf32>
    %15 = tpu.matmul %13, %14, %cst_10 {dimension_numbers = #tpu.dot_dimension_numbers<[1], [0], [0], [1], [0, 0, 1, 1], [], []>} : vector<8x64xf32>, vector<64x128xf32>, vector<8x128xf32> -> vector<8x128xf32>
    %c0_11 = arith.constant 0 : index
    %c0_12 = arith.constant 0 : index
    %16 = vector.load %arg5[%c0_11, %c0_12] : memref<1x128xf32, #tpu.memory_space<vmem>>, vector<1x128xf32>
    %17 = vector.broadcast %16 : vector<1x128xf32> to vector<8x128xf32>
    %18 = arith.addf %15, %17 : vector<8x128xf32>
    %c0_13 = arith.constant 0 : index
    %c0_14 = arith.constant 0 : index
    %19 = vector.load %arg6[%c0_13, %c0_14] : memref<8x128xf32, #tpu.memory_space<vmem>>, vector<8x128xf32>
    tpu.vector_store %arg6[%c0_13, %c0_14], %18 {strides = array<i32>} : memref<8x128xf32, #tpu.memory_space<vmem>>, vector<8x128xf32>,
    return
  }
  func.func @transform_0(%arg0: i32) -> (i32, i32) {
    %c0_i32 = arith.constant 0 : i32
    %c0_i32_0 = arith.constant 0 : i32
    return %arg0, %c0_i32 : i32, i32
  }
  func.func @transform_1(%arg0: i32) -> (i32, i32) {
    %c0_i32 = arith.constant 0 : i32
    %c0_i32_0 = arith.constant 0 : i32
    %c0_i32_1 = arith.constant 0 : i32
    return %c0_i32, %c0_i32_0 : i32, i32
  }
  func.func @transform_2(%arg0: i32) -> (i32, i32) {
    %c0_i32 = arith.constant 0 : i32
    %c0_i32_0 = arith.constant 0 : i32
    %c0_i32_1 = arith.constant 0 : i32
    return %c0_i32, %c0_i32_0 : i32, i32
  }
  func.func @transform_3(%arg0: i32) -> (i32, i32) {
    %c0_i32 = arith.constant 0 : i32
    %c0_i32_0 = arith.constant 0 : i32
    %c0_i32_1 = arith.constant 0 : i32
    return %c0_i32, %c0_i32_0 : i32, i32
  }
  func.func @transform_4(%arg0: i32) -> (i32, i32) {
    %c0_i32 = arith.constant 0 : i32
    %c0_i32_0 = arith.constant 0 : i32
    %c0_i32_1 = arith.constant 0 : i32
    return %c0_i32, %c0_i32_0 : i32, i32
  }
  func.func @transform_5(%arg0: i32) -> (i32, i32) {
    %c0_i32 = arith.constant 0 : i32
    %c0_i32_0 = arith.constant 0 : i32
    return %arg0, %c0_i32 : i32, i32
  }
}

module attributes {stable_mosaic.version = 11 : i64} {
  func.func @_mlp_kernel_resident(%arg0: i32, %arg1: memref<8x32xf32, #tpu.memory_space<vmem>>, %arg2: memref<32x64xf32, #tpu.memory_space<vmem>>, %arg3: memref<1x64xf32, #tpu.memory_space<vmem>>, %arg4: memref<64x128xf32, #tpu.memory_space<vmem>>, %arg5: memref<1x128xf32, #tpu.memory_space<vmem>>, %arg6: memref<8x128xf32, #tpu.memory_space<vmem>>) attributes {dimension_semantics = [#tpu.dimension_semantics<parallel>], iteration_bounds = array<i64: 2>, scalar_prefetch = 0 : i64, scratch_operands = 0 : i64, tpu.core_type = #tpu.core_type<tc>, window_params = [{transform_indices = @transform_0, window_bounds = array<i64: 8, 32>}, {pipeline_mode = #tpu.pipeline_mode<synchronous>, transform_indices = @transform_1, window_bounds = array<i64: 32, 64>}, {pipeline_mode = #tpu.pipeline_mode<synchronous>, transform_indices = @transform_2, window_bounds = array<i64: 1, 64>}, {pipeline_mode = #tpu.pipeline_mode<synchronous>, transform_indices = @transform_3, window_bounds = array<i64: 64, 128>}, {pipeline_mode = #tpu.pipeline_mode<synchronous>, transform_indices = @transform_4, window_bounds = array<i64: 1, 128>}, {transform_indices = @transform_5, window_bounds = array<i64: 8, 128>}]} {
    %c0 = arith.constant 0 : index
    %c0_0 = arith.constant 0 : index
    %0 = vector.load %arg1[%c0, %c0_0] : memref<8x32xf32, #tpu.memory_space<vmem>>, vector<8x32xf32>
    %c0_1 = arith.constant 0 : index
    %c0_2 = arith.constant 0 : index
    %1 = vector.load %arg2[%c0_1, %c0_2] : memref<32x64xf32, #tpu.memory_space<vmem>>, vector<32x64xf32>
    %cst = arith.constant dense<0.000000e+00> : vector<8x64xf32>
    %2 = tpu.matmul %0, %1, %cst {dimension_numbers = #tpu.dot_dimension_numbers<[1], [0], [0], [1], [0, 0, 1, 1], [], []>} : vector<8x32xf32>, vector<32x64xf32>, vector<8x64xf32> -> vector<8x64xf32>
    %c0_3 = arith.constant 0 : index
    %c0_4 = arith.constant 0 : index
    %3 = vector.load %arg3[%c0_3, %c0_4] : memref<1x64xf32, #tpu.memory_space<vmem>>, vector<1x64xf32>
    %4 = vector.broadcast %3 : vector<1x64xf32> to vector<8x64xf32>
    %5 = arith.addf %2, %4 : vector<8x64xf32>
    %cst_5 = arith.constant 5.000000e-01 : f32
    %6 = vector.broadcast %cst_5 : f32 to vector<8x64xf32>
    %7 = arith.mulf %6, %5 : vector<8x64xf32>
    %cst_6 = arith.constant 0.707106769 : f32
    %8 = vector.broadcast %cst_6 : f32 to vector<8x64xf32>
    %9 = arith.mulf %5, %8 : vector<8x64xf32>
    %10 = math.erf %9 : vector<8x64xf32>
    %cst_7 = arith.constant 1.000000e+00 : f32
    %11 = vector.broadcast %cst_7 : f32 to vector<8x64xf32>
    %12 = arith.addf %11, %10 : vector<8x64xf32>
    %13 = arith.mulf %7, %12 : vector<8x64xf32>
    %c0_8 = arith.constant 0 : index
    %c0_9 = arith.constant 0 : index
    %14 = vector.load %arg4[%c0_8, %c0_9] : memref<64x128xf32, #tpu.memory_space<vmem>>, vector<64x128xf32>
    %cst_10 = arith.constant dense<0.000000e+00> : vector<8x128xf32>
    %15 = tpu.matmul %13, %14, %cst_10 {dimension_numbers = #tpu.dot_dimension_numbers<[1], [0], [0], [1], [0, 0, 1, 1], [], []>} : vector<8x64xf32>, vector<64x128xf32>, vector<8x128xf32> -> vector<8x128xf32>
    %c0_11 = arith.constant 0 : index
    %c0_12 = arith.constant 0 : index
    %16 = vector.load %arg5[%c0_11, %c0_12] : memref<1x128xf32, #tpu.memory_space<vmem>>, vector<1x128xf32>
    %17 = vector.broadcast %16 : vector<1x128xf32> to vector<8x128xf32>
    %18 = arith.addf %15, %17 : vector<8x128xf32>
    %c0_13 = arith.constant 0 : index
    %c0_14 = arith.constant 0 : index
    %19 = vector.load %arg6[%c0_13, %c0_14] : memref<8x128xf32, #tpu.memory_space<vmem>>, vector<8x128xf32>
    tpu.vector_store %arg6[%c0_13, %c0_14], %18 {strides = array<i32>} : memref<8x128xf32, #tpu.memory_space<vmem>>, vector<8x128xf32>,
    return
  }
  func.func @transform_0(%arg0: i32) -> (i32, i32) {
    %c0_i32 = arith.constant 0 : i32
    %c0_i32_0 = arith.constant 0 : i32
    return %arg0, %c0_i32 : i32, i32
  }
  func.func @transform_1(%arg0: i32) -> (i32, i32) {
    %c0_i32 = arith.constant 0 : i32
    %c0_i32_0 = arith.constant 0 : i32
    %c0_i32_1 = arith.constant 0 : i32
    return %c0_i32, %c0_i32_0 : i32, i32
  }
  func.func @transform_2(%arg0: i32) -> (i32, i32) {
    %c0_i32 = arith.constant 0 : i32
    %c0_i32_0 = arith.constant 0 : i32
    %c0_i32_1 = arith.constant 0 : i32
    return %c0_i32, %c0_i32_0 : i32, i32
  }
  func.func @transform_3(%arg0: i32) -> (i32, i32) {
    %c0_i32 = arith.constant 0 : i32
    %c0_i32_0 = arith.constant 0 : i32
    %c0_i32_1 = arith.constant 0 : i32
    return %c0_i32, %c0_i32_0 : i32, i32
  }
  func.func @transform_4(%arg0: i32) -> (i32, i32) {
    %c0_i32 = arith.constant 0 : i32
    %c0_i32_0 = arith.constant 0 : i32
    %c0_i32_1 = arith.constant 0 : i32
    return %c0_i32, %c0_i32_0 : i32, i32
  }
  func.func @transform_5(%arg0: i32) -> (i32, i32) {
    %c0_i32 = arith.constant 0 : i32
    %c0_i32_0 = arith.constant 0 : i32
    return %arg0, %c0_i32 : i32, i32
  }
}

</mosaic_0001>

<bundles_post_ra>
// kernel: tpu_custom_call.1
= control target key start
LH: loop header
LB: loop body
LE: loop exit
PB: predicated region body
PF: predicated region fallthrough
CT: control target
= control target key end

     0   :  { %10 = vsyncpa [#allocation3], 0  ;;  %s1145_s0 = inlined_call_operand.hbm [shape: f32[16,32], index: 0, kind: input, shape index: {}]   ;;  %s1146_s1 = inlined_call_operand.hbm [shape: f32[32,64], index: 1, kind: input, shape index: {}]   ;;  %s1147_s2 = inlined_call_operand.vmem [shape: f32[1,64], index: 2, kind: input, shape index: {}]   ;;  %s1148_s3 = inlined_call_operand.hbm [shape: f32[64,128], index: 3, kind: input, shape index: {}]   ;;  %s1149_s4 = inlined_call_operand.vmem [shape: f32[1,128], index: 4, kind: input, shape index: {}]   ;;  %s1150_s5 = inlined_call_operand.hbm [shape: f32[16,128], index: 5, kind: output, shape index: {}]  }
   0x1   :  { %12 = vsyncpa [#allocation3 + $0x1], 0 }
   0x2   :  { %13 = vsyncpa [#allocation6], 0 }
   0x3   :  { %14 = vsyncpa [#allocation4], 0 }
   0x4   :  { %16 = vsyncpa [#allocation4 + $0x1], 0  ;;  %s906_s18 = smov 0   ;;  %s908_s19 = smov 0  }
   0x5   :  { %s910_s20 = smov 0   ;;  %s912_s21 = smov 0  }
   0x6 LB: > { %s927_s22 = sadd.s32 4294967295, %s865_s21   ;;  %s553_s23 = sadd.s32 4294967294, %s865_s21   ;;  %s865_s21 = sphi %s912_s21, %s1170_s21   ;;  %s861_s20 = sphi %s910_s20, %s1169_s20   ;;  %s857_s19 = sphi %s908_s19, %s1168_s19   ;;  %s853_s18 = sphi %s906_s18, %s1167_s18  }
   0x7   : > { %p42_p0 = scmp.ne.s32.totalorder %s857_s19, %s853_s18  ;;  %p1151_p1 = scmp.eq.s32.totalorder %s927_s22, 0 }
   0x8   : > { %p156_p3 = scmp.eq.s32.totalorder %s553_s23, 1  ;;  %p554_p5 = scmp.ge.s32.totalorder %s865_s21, 1 }
   0x9   : > { %p936_p4 = por %p1151_p1, %p42_p0  ;;  %p163_p7 = scmp.lt.s32.totalorder %s865_s21, 3 }
   0xa   : > { %p941_p6 = por %p156_p3, %p42_p0  ;;  %s867_s27 = smov [#allocation5]  }
   0xb   : > { %s1154_s24 = scalar_select %p936_p4, 1, 0 }
   0xc   : > { %s1155_s25 = scalar_select %p941_p6, 1, 0 }
   0xd   : > { %p946_p8 = pnand %p554_p5, %p163_p7  ;;  %s175_s28 = sshll.u32 %s867_s27, 4  ;;  %s950_s28 = int_to_ptr.vmem [resolvable:$true] %s175_s28 }
   0xe   : > { %s868_s30 = smov [#allocation7]   ;;  %s709_s9 = scalar_lea.hbm %s1146_s1, 512 }
   0xf   : > { %p647_p9 = pneg %p946_p8  ;;  %s191_s6 = sshll.u32 %s868_s30, 4  ;;  %s961_s6 = int_to_ptr.vmem [resolvable:$true] %s191_s6 }
  0x10   : > { %p710_p12 = scmp.ne.s32.totalorder %s1146_s1, %s709_s9  ;;  %p716_p5 = scmp.lt.u32.totalorder %s709_s9, %s1146_s1 }
  0x11   : > { %p957_p11 = pnand %p647_p9, %p1151_p1 }
  0x13   : > { %p711_p13 = pneg %p957_p11 }
  0x15   : > { %p712_p0 = pnand %p711_p13, %p710_p12 }
  0x17   : > { %p713_p3 = pneg %p712_p0 }
  0x19   : > { %p718_p7 = pnand %p716_p5, %p713_p3 }
  0x1b   : > { %721 = shalt.err (!%p718_p7)
}
  0x1c   : > { %s722_s14 = scalar_lea.vmem %s950_s28, 512  ;;  %p730_p2 = scmp.lt.s32.totalorder %s950_s28, %s950_s28 }
  0x1d   : > { %p723_p9 = scmp.ne.s32.totalorder %s950_s28, %s722_s14  ;;  %p731_p12 = scmp.lt.s32.totalorder %s722_s14, %s722_s14 }
  0x1f   : > { %p725_p10 = pnand %p723_p9, %p711_p13  ;;  %p732_p0 = por %p731_p12, %p730_p2 }
  0x21   : > { %p726_p1 = pneg %p725_p10 }
  0x23   : > { %p733_p6 = pnand %p732_p0, %p726_p1 }
  0x25   : > { %736 = shalt.err (!%p733_p6)
}
  0x26   : > { %s869_s15 = smov 128   ;;  %s870_s16 = smov 8  }
  0x27   : > { %650 = dma.hbm_to_vmem [thread:$0]  (!%p957_p11), %s1146_s1, 512, %s950_s28, [#allocation6], %s869_s15, %s869_s15, %s870_s16  }
  0x28   : > { %s737_s7 = scalar_lea.hbm %s1148_s3, 1024 }
  0x29   : > { %p738_p2 = scmp.ne.s32.totalorder %s1148_s3, %s737_s7  ;;  %p744_p10 = scmp.lt.u32.totalorder %s737_s7, %s1148_s3 }
  0x2b   : > { %p740_p1 = pnand %p738_p2, %p711_p13 }
  0x2d   : > { %p741_p6 = pneg %p740_p1 }
  0x2f   : > { %p746_p3 = pnand %p744_p10, %p741_p6 }
  0x31   : > { %749 = shalt.err (!%p746_p3)
}
  0x32   : > { %s750_s28 = scalar_lea.vmem %s961_s6, 1024  ;;  %p758_p12 = scmp.lt.s32.totalorder %s961_s6, %s961_s6 }
  0x33   : > { %p751_p5 = scmp.ne.s32.totalorder %s961_s6, %s750_s28  ;;  %p759_p0 = scmp.lt.s32.totalorder %s750_s28, %s750_s28 }
  0x35   : > { %p753_p7 = pnand %p751_p5, %p711_p13  ;;  %p760_p2 = por %p759_p0, %p758_p12 }
  0x37   : > { %p754_p9 = pneg %p753_p7 }
  0x39   : > { %p761_p1 = pnand %p760_p2, %p754_p9 }
  0x3b   : > { %764 = shalt.err (!%p761_p1)
}
  0x3c   : > { %653 = dma.hbm_to_vmem [thread:$0]  (!%p957_p11), %s1148_s3, 1024, %s961_s6, [#allocation6], %s869_s15, %s869_s15, %s870_s16  }
  0x3d   : > { %s1016_s14 = sadd.s32 1, %s865_s21   ;;  %s29_s29 = sadd.s32 1, %s861_s20 }
  0x3e   : > { %s26_s17 = ssub.s32 %s865_s21, %s1016_s14  ;;  %p36_p13 = scmp.ne.s32.totalorder %s861_s20, %s857_s19 }
  0x3f   : > { %p27_p6 = scmp.eq.s32.totalorder %s26_s17, 0  ;;  %p37_p10 = scmp.eq.s32.totalorder %s865_s21, 0 }
  0x40   : > { %p1158_p3 = scmp.eq.s32.totalorder %s927_s22, 1  ;;  %p664_p7 = scmp.lt.s32.totalorder %s865_s21, 2 }
  0x41   : > { %s1032_s27 = scalar_select %p27_p6, %s861_s20, %s29_s29  }
  0x42   : > { %p1026_p5 = por %p1158_p3, %p36_p13  ;;  %p38_p9 = por %p37_p10, %p36_p13 }
  0x43   : > { %s208_s30 = sand.u32 1, %s861_s20   ;;  %s559_s6 = sshll.u32 %s865_s21, 7 }
  0x44   : > { %s1159_s23 = scalar_select %p1026_p5, 1, 0 }
  0x45   : > { %s558_s7 = sshll.u32 %s208_s30, 3  ;;  %s1039_s8 = scalar_lea.hbm %s1145_s0, %s559_s6 }
  0x46   : > { %s212_s9 = scalar_lea.vmem [#allocation2], %s558_s7  ;;  %p1043_p11 = pnand %p664_p7, %p38_p9 }
  0x47   : > { %s219_s10 = sshll.u32 %s212_s9, 4  ;;  %s209_s28 = scalar_lea.sflag [#allocation3], %s208_s30  ;;  %s1041_s10 = int_to_ptr.vmem [resolvable:$true] %s219_s10 }
  0x48   : > { %s765_s12 = scalar_lea.hbm %s1039_s8, 128  ;;  %p767_p0 = pneg %p1043_p11 }
  0x49   : > { %p766_p12 = scmp.ne.s32.totalorder %s1039_s8, %s765_s12  ;;  %s770_s17 = scalar_lea.hbm %s1145_s0, 256 }
  0x4a   : > { %p771_p13 = scmp.lt.u32.totalorder %s1039_s8, %s1145_s0  ;;  %p772_p6 = scmp.lt.u32.totalorder %s770_s17, %s765_s12 }
  0x4b   : > { %p768_p2 = pnand %p767_p0, %p766_p12  ;;  %p774_p3 = scmp.lt.u32.totalorder %s765_s12, %s1039_s8 }
  0x4c   : > { %p773_p10 = por %p772_p6, %p771_p13 }
  0x4d   : > { %p769_p1 = pneg %p768_p2 }
  0x4e   : > { %p775_p7 = por %p774_p3, %p773_p10 }
  0x50   : > { %p776_p9 = pnand %p775_p7, %p769_p1 }
  0x52   : > { %779 = shalt.err (!%p776_p9)
}
  0x53   : > { %s780_s30 = scalar_lea.vmem %s1041_s10, 128  ;;  %s871_s15 = smov [#allocation2]  }
  0x54   : > { %p781_p12 = scmp.ne.s32.totalorder %s1041_s10, %s780_s30  ;;  %s785_s16 = sshll.u32 %s871_s15, 4  ;;  %s786_s16 = int_to_ptr.vmem [resolvable:$false] %s785_s16 }
  0x55   : > { %s787_s9 = scalar_lea.vmem %s786_s16, 256  ;;  %p788_p4 = scmp.lt.s32.totalorder %s1041_s10, %s786_s16 }
  0x56   : > { %p783_p2 = pnand %p781_p12, %p767_p0  ;;  %p789_p13 = scmp.lt.s32.totalorder %s787_s9, %s780_s30 }
  0x58   : > { %p784_p5 = pneg %p783_p2  ;;  %p790_p6 = por %p789_p13, %p788_p4 }
  0x5a   : > { %p791_p10 = pnand %p790_p6, %p784_p5 }
  0x5c   : > { %794 = shalt.err (!%p791_p10)
}
  0x5d   : > { %657 = dma.hbm_to_vmem [thread:$0]  (!%p1043_p11), %s1039_s8, 128, %s1041_s10, %s209_s28  }
  0x5e   : > { %228 = sbr.rel (%p946_p8) target bundleno = 574 (0x23e), region = 40  ;;  %s1075_s12 = sand.u32 (!%p946_p8), 1, %s857_s19  }
  0x5f   : > { %s561_s13 = sshll.u32 (!%p946_p8), %s1075_s12, 3  ;;  %s231_s29 = scalar_lea.sflag (!%p946_p8), [#allocation3], %s1075_s12 }
  0x60   : > { %s234_s17 = scalar_lea.vmem (!%p946_p8), [#allocation2], %s561_s13  ;;  %p1161_p4 = scmp.ne.s32.totalorder (!%p946_p8), %s1154_s24, 0 }
  0x65   : > { %840 = dma.done.wait (%p1161_p4), %s231_s29, 128  }
  0x66   : > { %842 = vsyncadd (%p1161_p4), %s231_s29, 4294967168  ;;  %p1162_p5 = scmp.eq.s32.totalorder %s927_s22, 0 }
  0x68   : > { %844 = dma.done.wait (%p1162_p5), [#allocation6], 1536   ;;  %p1163_p8 = pmov %p1162_p5 }
  0x69   : > { %v872_v0 = vmov 0.0|0.0   ;;  %vm873_vm0 = vmmov 0   ;;  %v874_v1 = vmov 0.0   ;;  %v270_v2 = vld [vmem:[#allocation5] sm:$0xff]  ;;  %v271_v3 = vld [vmem:[#allocation5 + $0x8] sm:$0xff]  ;;  %v272_v4 = vld [vmem:[#allocation5 + $0x10] sm:$0xff] }
  0x6a   : > { %846 = vsyncadd (%p1163_p8), [#allocation6], 4294965760  ;;  %617 = vmatprep.subr.bf16.mxu0 %v872_v0  ;;  %595 = vmatprep.mubr.msk.f32.mxu0 %vm873_vm0, %v874_v1  ;;  %v618_v5 = vpack.c.bf16 %v271_v3, %v270_v2  ;;  %v273_v6 = vld [vmem:[#allocation5 + $0x18] sm:$0xff]  ;;  %vm281_vm1 = vcmask 261120   ;;  %v360_v9 = vld [vmem:[#allocation7] sm:$0xff]  ;;  %vm375_vm2 = vcmask 523264  }
  0x6b   : > { %623 = vmatprep.subr.bf16.mxu1 %v872_v0  ;;  %614 = vmatprep.mubr.msk.f32.mxu1 %vm873_vm0, %v874_v1  ;;  %v621_v7 = vpack.c.bf16 %v273_v6, %v272_v4  ;;  %v269_v8 = vld [vmem:[%s234_s17] sm:$0xff]  ;;  %v361_v10 = vld [vmem:[#allocation7 + $0x8] sm:$0xff]  ;;  %v364_v15 = vld [vmem:[#allocation7 + $0x20] sm:$0xff]  ;;  %s570_s11 = sshll.u32 %s927_s22, 7  ;;  %s268_s28 = scalar_lea.vmem [#allocation8], %s561_s13 }
  0x6c   : > { %619 = vmatpush3.bf16.msra.mxu0 %v618_v5  ;;  %v624_v11 = vpack.c.bf16 %v361_v10, %v360_v9  ;;  %v362_v12 = vld [vmem:[#allocation7 + $0x10] sm:$0xff]  ;;  %v363_v13 = vld [vmem:[#allocation7 + $0x18] sm:$0xff]  ;;  %v365_v16 = vld [vmem:[#allocation7 + $0x28] sm:$0xff]  ;;  %s464_s7 = sshll.u32 %s268_s28, 4  ;;  %s1101_s15 = scalar_lea.hbm %s1150_s5, %s570_s11  ;;  %s1103_s7 = int_to_ptr.vmem [resolvable:$true] %s464_s7 }
  0x6d   : > { %620 = vmatprep.subr.bf16.mxu0 %v872_v0  ;;  %v627_v14 = vpack.c.bf16 %v363_v13, %v362_v12  ;;  %v630_v17 = vpack.c.bf16 %v365_v16, %v364_v15  ;;  %v366_v18 = vld [vmem:[#allocation7 + $0x30] sm:$0xff]  ;;  %v367_v19 = vld [vmem:[#allocation7 + $0x38] sm:$0xff]  ;;  %s451_s16 = scalar_lea.sflag [#allocation4], %s1075_s12  ;;  %s795_s9 = scalar_lea.vmem %s1103_s7, 128 }
  0x6e   : > { %625 = vmatpush3.bf16.msra.mxu1 %v624_v11  ;;  %v633_v20 = vpack.c.bf16 %v367_v19, %v366_v18  ;;  %v565_v21 = vld [vmem:[%s1147_s2] ss:$0 sm:$0xff]  ;;  %p796_p11 = scmp.ne.s32.totalorder %s1103_s7, %s795_s9  ;;  %p1164_p0 = scmp.ne.s32.totalorder %s1159_s23, 0 }
  0x6f   : > { %626 = vmatprep.subr.bf16.mxu1 %v872_v0  ;;  %v567_v30 = vld [vmem:[%s1149_s4] ss:$0 sm:$0xff]  ;;  %s875_s22 = smov [#allocation8]  }
  0x70   : > { %622 = vmatpush3.bf16.msra.mxu0 %v621_v7  ;;  %p797_p1 = pnand %p796_p11, %p1164_p0  ;;  %s799_s13 = sshll.u32 %s875_s22, 4  ;;  %s800_s13 = int_to_ptr.vmem [resolvable:$false] %s799_s13 }
  0x71   : > { %s801_s29 = scalar_lea.vmem %s800_s13, 256  ;;  %p802_p7 = scmp.lt.s32.totalorder %s1103_s7, %s800_s13 }
  0x72   : > { %628 = vmatpush3.bf16.msra.mxu1 %v627_v14  ;;  %p798_p3 = pneg %p797_p1  ;;  %p803_p9 = scmp.lt.s32.totalorder %s801_s29, %s795_s9 }
  0x73   : > { %596 = vmatmul.mubr.msk.f32.vlgmr.msra.gmra.mrb[0].mxu0 %vm281_vm1, %v269_v8  ;;  %629 = vmatprep.subr.bf16.mxu1 %v872_v0 }
  0x74   : > { %p804_p12 = por %p803_p9, %p802_p7 }
  0x76   : > { %631 = vmatpush3.bf16.msra.mxu1 %v630_v17  ;;  %p805_p2 = pnand %p804_p12, %p798_p3 }
  0x77   : > { %632 = vmatprep.subr.bf16.mxu1 %v872_v0 }
  0x7a   : > { %634 = vmatpush3.bf16.msra.mxu1 %v633_v20 }
 0x146   : > { %v351_v22 = vpop.f32.mrb[0].mxu0 }
 0x147   : > { %v352_v23 = vadd.f32 %v565_v21, %v351_v22  ;;  %v597_v24 = vpop.f32.mrb[1].mxu0 }
 0x149   : > { %v356_v25 = vmul.f32 0.70710677, %v352_v23  ;;  %v355_v27 = vmul.f32 0.5, %v352_v23 }
 0x14b   : > { %707 = verf.f32 %v356_v25 }
 0x155   : > { %v708_v26 = vpop.eup %707 }
 0x156   : > { %v358_v28 = vadd.f32 1.0, %v708_v26 }
 0x158   : > { %v359_v29 = vmul.f32 %v358_v28, %v355_v27 }
 0x15a   : > { %615 = vmatmul.mubr.msk.f32.vlgmr.msra.gmra.mrb[0].mxu1 %vm375_vm2, %v359_v29 }
 0x22d   : > { %v445_v31 = vpop.f32.mrb[0].mxu1 }
 0x22e   : > { %v446_v32 = vadd.f32 %v567_v30, %v445_v31  ;;  %v616_v33 = vpop.f32.mrb[1].mxu1 }
 0x230   : > { %449 = vst [vmem:[%s268_s28] sm:$0xff] %v446_v32 }
 0x231   : > { %808 = shalt.err (!%p805_p2)
}
 0x232   : > { %s809_s12 = scalar_lea.hbm %s1101_s15, 128  ;;  %s813_s26 = scalar_lea.hbm %s1150_s5, 256 }
 0x233   : > { %p810_p13 = scmp.ne.s32.totalorder %s1101_s15, %s809_s12  ;;  %p814_p4 = scmp.lt.u32.totalorder %s1101_s15, %s1150_s5 }
 0x234   : > { %p815_p5 = scmp.lt.u32.totalorder %s813_s26, %s809_s12  ;;  %p817_p11 = scmp.lt.u32.totalorder %s809_s12, %s1101_s15 }
 0x235   : > { %p811_p6 = pnand %p810_p13, %p1164_p0 }
 0x236   : > { %p816_p8 = por %p815_p5, %p814_p4 }
 0x237   : > { %p812_p10 = pneg %p811_p6 }
 0x238   : > { %p818_p1 = por %p817_p11, %p816_p8 }
 0x23a   : > { %p819_p3 = pnand %p818_p1, %p812_p10 }
 0x23c   : > { %822 = shalt.err (!%p819_p3)
}
 0x23d   : > { %645 = dma.vmem_to_hbm [thread:$0]  (%p1164_p0), %s1103_s7, 128, %s1101_s15, %s451_s16  }
 0x23e PF: > { %s476_s11 = sand.u32 1, %s853_s18   ;;  %p1165_p7 = scmp.ne.s32.totalorder %s1155_s25, 0 }
 0x23f   : > { %p1166_p9 = scmp.ge.s32.totalorder %s865_s21, 2  ;;  %s477_s28 = scalar_lea.sflag [#allocation4], %s476_s11 }
 0x241   : > { %p659_p12 = pnand %p1166_p9, %p1165_p7 }
 0x243   : > { %848 = dma.done.wait (!%p659_p12), %s477_s28, 128  }
 0x244   : > { %850 = vsyncadd (!%p659_p12), %s477_s28, 4294967168  ;;  %p19_p2 = scmp.ge.s32.totalorder %s1016_s14, 4   ;;  %s1167_s18 = smov %s857_s19 }
 0x245   : > { %s1168_s19 = smov %s861_s20  ;;  %s1169_s20 = smov %s1032_s27 }
 0x246   : > { %s1170_s21 = smov %s1016_s14  ;;  %21 = sbr.rel (!%p19_p2) target bundleno = 6 (0x6), region = 93 }
 0x24d   :  { %482 = vsyncpa [#allocation3], 1 }
 0x24e   :  { %484 = vsyncpa [#allocation3 + $0x1], 1 }
 0x24f   :  { %485 = vsyncpa [#allocation6], 1 }
 0x250   :  { %486 = vsyncpa [#allocation4], 1 }
 0x251   :  { %488 = vsyncpa [#allocation4 + $0x1], 1 }

// kernel: tpu_custom_call.1
= control target key start
LH: loop header
LB: loop body
LE: loop exit
PB: predicated region body
PF: predicated region fallthrough
CT: control target
= control target key end

     0   :  { %10 = vsyncpa [#allocation3], 0  ;;  %s1145_s0 = inlined_call_operand.hbm [shape: f32[16,32], index: 0, kind: input, shape index: {}]   ;;  %s1146_s1 = inlined_call_operand.hbm [shape: f32[32,64], index: 1, kind: input, shape index: {}]   ;;  %s1147_s2 = inlined_call_operand.vmem [shape: f32[1,64], index: 2, kind: input, shape index: {}]   ;;  %s1148_s3 = inlined_call_operand.hbm [shape: f32[64,128], index: 3, kind: input, shape index: {}]   ;;  %s1149_s4 = inlined_call_operand.vmem [shape: f32[1,128], index: 4, kind: input, shape index: {}]   ;;  %s1150_s5 = inlined_call_operand.hbm [shape: f32[16,128], index: 5, kind: output, shape index: {}]  }
   0x1   :  { %12 = vsyncpa [#allocation3 + $0x1], 0 }
   0x2   :  { %13 = vsyncpa [#allocation6], 0 }
   0x3   :  { %14 = vsyncpa [#allocation4], 0 }
   0x4   :  { %16 = vsyncpa [#allocation4 + $0x1], 0  ;;  %s906_s18 = smov 0   ;;  %s908_s19 = smov 0  }
   0x5   :  { %s910_s20 = smov 0   ;;  %s912_s21 = smov 0  }
   0x6 LB: > { %s927_s22 = sadd.s32 4294967295, %s865_s21   ;;  %s553_s23 = sadd.s32 4294967294, %s865_s21   ;;  %s865_s21 = sphi %s912_s21, %s1170_s21   ;;  %s861_s20 = sphi %s910_s20, %s1169_s20   ;;  %s857_s19 = sphi %s908_s19, %s1168_s19   ;;  %s853_s18 = sphi %s906_s18, %s1167_s18  }
   0x7   : > { %p42_p0 = scmp.ne.s32.totalorder %s857_s19, %s853_s18  ;;  %p1151_p1 = scmp.eq.s32.totalorder %s927_s22, 0 }
   0x8   : > { %p156_p3 = scmp.eq.s32.totalorder %s553_s23, 1  ;;  %p554_p5 = scmp.ge.s32.totalorder %s865_s21, 1 }
   0x9   : > { %p936_p4 = por %p1151_p1, %p42_p0  ;;  %p163_p7 = scmp.lt.s32.totalorder %s865_s21, 3 }
   0xa   : > { %p941_p6 = por %p156_p3, %p42_p0  ;;  %s867_s27 = smov [#allocation5]  }
   0xb   : > { %s1154_s24 = scalar_select %p936_p4, 1, 0 }
   0xc   : > { %s1155_s25 = scalar_select %p941_p6, 1, 0 }
   0xd   : > { %p946_p8 = pnand %p554_p5, %p163_p7  ;;  %s175_s28 = sshll.u32 %s867_s27, 4  ;;  %s950_s28 = int_to_ptr.vmem [resolvable:$true] %s175_s28 }
   0xe   : > { %s868_s30 = smov [#allocation7]   ;;  %s709_s9 = scalar_lea.hbm %s1146_s1, 512 }
   0xf   : > { %p647_p9 = pneg %p946_p8  ;;  %s191_s6 = sshll.u32 %s868_s30, 4  ;;  %s961_s6 = int_to_ptr.vmem [resolvable:$true] %s191_s6 }
  0x10   : > { %p710_p12 = scmp.ne.s32.totalorder %s1146_s1, %s709_s9  ;;  %p716_p5 = scmp.lt.u32.totalorder %s709_s9, %s1146_s1 }
  0x11   : > { %p957_p11 = pnand %p647_p9, %p1151_p1 }
  0x13   : > { %p711_p13 = pneg %p957_p11 }
  0x15   : > { %p712_p0 = pnand %p711_p13, %p710_p12 }
  0x17   : > { %p713_p3 = pneg %p712_p0 }
  0x19   : > { %p718_p7 = pnand %p716_p5, %p713_p3 }
  0x1b   : > { %721 = shalt.err (!%p718_p7)
}
  0x1c   : > { %s722_s14 = scalar_lea.vmem %s950_s28, 512  ;;  %p730_p2 = scmp.lt.s32.totalorder %s950_s28, %s950_s28 }
  0x1d   : > { %p723_p9 = scmp.ne.s32.totalorder %s950_s28, %s722_s14  ;;  %p731_p12 = scmp.lt.s32.totalorder %s722_s14, %s722_s14 }
  0x1f   : > { %p725_p10 = pnand %p723_p9, %p711_p13  ;;  %p732_p0 = por %p731_p12, %p730_p2 }
  0x21   : > { %p726_p1 = pneg %p725_p10 }
  0x23   : > { %p733_p6 = pnand %p732_p0, %p726_p1 }
  0x25   : > { %736 = shalt.err (!%p733_p6)
}
  0x26   : > { %s869_s15 = smov 128   ;;  %s870_s16 = smov 8  }
  0x27   : > { %650 = dma.hbm_to_vmem [thread:$0]  (!%p957_p11), %s1146_s1, 512, %s950_s28, [#allocation6], %s869_s15, %s869_s15, %s870_s16  }
  0x28   : > { %s737_s7 = scalar_lea.hbm %s1148_s3, 1024 }
  0x29   : > { %p738_p2 = scmp.ne.s32.totalorder %s1148_s3, %s737_s7  ;;  %p744_p10 = scmp.lt.u32.totalorder %s737_s7, %s1148_s3 }
  0x2b   : > { %p740_p1 = pnand %p738_p2, %p711_p13 }
  0x2d   : > { %p741_p6 = pneg %p740_p1 }
  0x2f   : > { %p746_p3 = pnand %p744_p10, %p741_p6 }
  0x31   : > { %749 = shalt.err (!%p746_p3)
}
  0x32   : > { %s750_s28 = scalar_lea.vmem %s961_s6, 1024  ;;  %p758_p12 = scmp.lt.s32.totalorder %s961_s6, %s961_s6 }
  0x33   : > { %p751_p5 = scmp.ne.s32.totalorder %s961_s6, %s750_s28  ;;  %p759_p0 = scmp.lt.s32.totalorder %s750_s28, %s750_s28 }
  0x35   : > { %p753_p7 = pnand %p751_p5, %p711_p13  ;;  %p760_p2 = por %p759_p0, %p758_p12 }
  0x37   : > { %p754_p9 = pneg %p753_p7 }
  0x39   : > { %p761_p1 = pnand %p760_p2, %p754_p9 }
  0x3b   : > { %764 = shalt.err (!%p761_p1)
}
  0x3c   : > { %653 = dma.hbm_to_vmem [thread:$0]  (!%p957_p11), %s1148_s3, 1024, %s961_s6, [#allocation6], %s869_s15, %s869_s15, %s870_s16  }
  0x3d   : > { %s1016_s14 = sadd.s32 1, %s865_s21   ;;  %s29_s29 = sadd.s32 1, %s861_s20 }
  0x3e   : > { %s26_s17 = ssub.s32 %s865_s21, %s1016_s14  ;;  %p36_p13 = scmp.ne.s32.totalorder %s861_s20, %s857_s19 }
  0x3f   : > { %p27_p6 = scmp.eq.s32.totalorder %s26_s17, 0  ;;  %p37_p10 = scmp.eq.s32.totalorder %s865_s21, 0 }
  0x40   : > { %p1158_p3 = scmp.eq.s32.totalorder %s927_s22, 1  ;;  %p664_p7 = scmp.lt.s32.totalorder %s865_s21, 2 }
  0x41   : > { %s1032_s27 = scalar_select %p27_p6, %s861_s20, %s29_s29  }
  0x42   : > { %p1026_p5 = por %p1158_p3, %p36_p13  ;;  %p38_p9 = por %p37_p10, %p36_p13 }
  0x43   : > { %s208_s30 = sand.u32 1, %s861_s20   ;;  %s559_s6 = sshll.u32 %s865_s21, 7 }
  0x44   : > { %s1159_s23 = scalar_select %p1026_p5, 1, 0 }
  0x45   : > { %s558_s7 = sshll.u32 %s208_s30, 3  ;;  %s1039_s8 = scalar_lea.hbm %s1145_s0, %s559_s6 }
  0x46   : > { %s212_s9 = scalar_lea.vmem [#allocation2], %s558_s7  ;;  %p1043_p11 = pnand %p664_p7, %p38_p9 }
  0x47   : > { %s219_s10 = sshll.u32 %s212_s9, 4  ;;  %s209_s28 = scalar_lea.sflag [#allocation3], %s208_s30  ;;  %s1041_s10 = int_to_ptr.vmem [resolvable:$true] %s219_s10 }
  0x48   : > { %s765_s12 = scalar_lea.hbm %s1039_s8, 128  ;;  %p767_p0 = pneg %p1043_p11 }
  0x49   : > { %p766_p12 = scmp.ne.s32.totalorder %s1039_s8, %s765_s12  ;;  %s770_s17 = scalar_lea.hbm %s1145_s0, 256 }
  0x4a   : > { %p771_p13 = scmp.lt.u32.totalorder %s1039_s8, %s1145_s0  ;;  %p772_p6 = scmp.lt.u32.totalorder %s770_s17, %s765_s12 }
  0x4b   : > { %p768_p2 = pnand %p767_p0, %p766_p12  ;;  %p774_p3 = scmp.lt.u32.totalorder %s765_s12, %s1039_s8 }
  0x4c   : > { %p773_p10 = por %p772_p6, %p771_p13 }
  0x4d   : > { %p769_p1 = pneg %p768_p2 }
  0x4e   : > { %p775_p7 = por %p774_p3, %p773_p10 }
  0x50   : > { %p776_p9 = pnand %p775_p7, %p769_p1 }
  0x52   : > { %779 = shalt.err (!%p776_p9)
}
  0x53   : > { %s780_s30 = scalar_lea.vmem %s1041_s10, 128  ;;  %s871_s15 = smov [#allocation2]  }
  0x54   : > { %p781_p12 = scmp.ne.s32.totalorder %s1041_s10, %s780_s30  ;;  %s785_s16 = sshll.u32 %s871_s15, 4  ;;  %s786_s16 = int_to_ptr.vmem [resolvable:$false] %s785_s16 }
  0x55   : > { %s787_s9 = scalar_lea.vmem %s786_s16, 256  ;;  %p788_p4 = scmp.lt.s32.totalorder %s1041_s10, %s786_s16 }
  0x56   : > { %p783_p2 = pnand %p781_p12, %p767_p0  ;;  %p789_p13 = scmp.lt.s32.totalorder %s787_s9, %s780_s30 }
  0x58   : > { %p784_p5 = pneg %p783_p2  ;;  %p790_p6 = por %p789_p13, %p788_p4 }
  0x5a   : > { %p791_p10 = pnand %p790_p6, %p784_p5 }
  0x5c   : > { %794 = shalt.err (!%p791_p10)
}
  0x5d   : > { %657 = dma.hbm_to_vmem [thread:$0]  (!%p1043_p11), %s1039_s8, 128, %s1041_s10, %s209_s28  }
  0x5e   : > { %228 = sbr.rel (%p946_p8) target bundleno = 574 (0x23e), region = 40  ;;  %s1075_s12 = sand.u32 (!%p946_p8), 1, %s857_s19  }
  0x5f   : > { %s561_s13 = sshll.u32 (!%p946_p8), %s1075_s12, 3  ;;  %s231_s29 = scalar_lea.sflag (!%p946_p8), [#allocation3], %s1075_s12 }
  0x60   : > { %s234_s17 = scalar_lea.vmem (!%p946_p8), [#allocation2], %s561_s13  ;;  %p1161_p4 = scmp.ne.s32.totalorder (!%p946_p8), %s1154_s24, 0 }
  0x65   : > { %840 = dma.done.wait (%p1161_p4), %s231_s29, 128  }
  0x66   : > { %842 = vsyncadd (%p1161_p4), %s231_s29, 4294967168  ;;  %p1162_p5 = scmp.eq.s32.totalorder %s927_s22, 0 }
  0x68   : > { %844 = dma.done.wait (%p1162_p5), [#allocation6], 1536   ;;  %p1163_p8 = pmov %p1162_p5 }
  0x69   : > { %v872_v0 = vmov 0.0|0.0   ;;  %vm873_vm0 = vmmov 0   ;;  %v874_v1 = vmov 0.0   ;;  %v270_v2 = vld [vmem:[#allocation5] sm:$0xff]  ;;  %v271_v3 = vld [vmem:[#allocation5 + $0x8] sm:$0xff]  ;;  %v272_v4 = vld [vmem:[#allocation5 + $0x10] sm:$0xff] }
  0x6a   : > { %846 = vsyncadd (%p1163_p8), [#allocation6], 4294965760  ;;  %617 = vmatprep.subr.bf16.mxu0 %v872_v0  ;;  %595 = vmatprep.mubr.msk.f32.mxu0 %vm873_vm0, %v874_v1  ;;  %v618_v5 = vpack.c.bf16 %v271_v3, %v270_v2  ;;  %v273_v6 = vld [vmem:[#allocation5 + $0x18] sm:$0xff]  ;;  %vm281_vm1 = vcmask 261120   ;;  %v360_v9 = vld [vmem:[#allocation7] sm:$0xff]  ;;  %vm375_vm2 = vcmask 523264  }
  0x6b   : > { %623 = vmatprep.subr.bf16.mxu1 %v872_v0  ;;  %614 = vmatprep.mubr.msk.f32.mxu1 %vm873_vm0, %v874_v1  ;;  %v621_v7 = vpack.c.bf16 %v273_v6, %v272_v4  ;;  %v269_v8 = vld [vmem:[%s234_s17] sm:$0xff]  ;;  %v361_v10 = vld [vmem:[#allocation7 + $0x8] sm:$0xff]  ;;  %v364_v15 = vld [vmem:[#allocation7 + $0x20] sm:$0xff]  ;;  %s570_s11 = sshll.u32 %s927_s22, 7  ;;  %s268_s28 = scalar_lea.vmem [#allocation8], %s561_s13 }
  0x6c   : > { %619 = vmatpush3.bf16.msra.mxu0 %v618_v5  ;;  %v624_v11 = vpack.c.bf16 %v361_v10, %v360_v9  ;;  %v362_v12 = vld [vmem:[#allocation7 + $0x10] sm:$0xff]  ;;  %v363_v13 = vld [vmem:[#allocation7 + $0x18] sm:$0xff]  ;;  %v365_v16 = vld [vmem:[#allocation7 + $0x28] sm:$0xff]  ;;  %s464_s7 = sshll.u32 %s268_s28, 4  ;;  %s1101_s15 = scalar_lea.hbm %s1150_s5, %s570_s11  ;;  %s1103_s7 = int_to_ptr.vmem [resolvable:$true] %s464_s7 }
  0x6d   : > { %620 = vmatprep.subr.bf16.mxu0 %v872_v0  ;;  %v627_v14 = vpack.c.bf16 %v363_v13, %v362_v12  ;;  %v630_v17 = vpack.c.bf16 %v365_v16, %v364_v15  ;;  %v366_v18 = vld [vmem:[#allocation7 + $0x30] sm:$0xff]  ;;  %v367_v19 = vld [vmem:[#allocation7 + $0x38] sm:$0xff]  ;;  %s451_s16 = scalar_lea.sflag [#allocation4], %s1075_s12  ;;  %s795_s9 = scalar_lea.vmem %s1103_s7, 128 }
  0x6e   : > { %625 = vmatpush3.bf16.msra.mxu1 %v624_v11  ;;  %v633_v20 = vpack.c.bf16 %v367_v19, %v366_v18  ;;  %v565_v21 = vld [vmem:[%s1147_s2] ss:$0 sm:$0xff]  ;;  %p796_p11 = scmp.ne.s32.totalorder %s1103_s7, %s795_s9  ;;  %p1164_p0 = scmp.ne.s32.totalorder %s1159_s23, 0 }
  0x6f   : > { %626 = vmatprep.subr.bf16.mxu1 %v872_v0  ;;  %v567_v30 = vld [vmem:[%s1149_s4] ss:$0 sm:$0xff]  ;;  %s875_s22 = smov [#allocation8]  }
  0x70   : > { %622 = vmatpush3.bf16.msra.mxu0 %v621_v7  ;;  %p797_p1 = pnand %p796_p11, %p1164_p0  ;;  %s799_s13 = sshll.u32 %s875_s22, 4  ;;  %s800_s13 = int_to_ptr.vmem [resolvable:$false] %s799_s13 }
  0x71   : > { %s801_s29 = scalar_lea.vmem %s800_s13, 256  ;;  %p802_p7 = scmp.lt.s32.totalorder %s1103_s7, %s800_s13 }
  0x72   : > { %628 = vmatpush3.bf16.msra.mxu1 %v627_v14  ;;  %p798_p3 = pneg %p797_p1  ;;  %p803_p9 = scmp.lt.s32.totalorder %s801_s29, %s795_s9 }
  0x73   : > { %596 = vmatmul.mubr.msk.f32.vlgmr.msra.gmra.mrb[0].mxu0 %vm281_vm1, %v269_v8  ;;  %629 = vmatprep.subr.bf16.mxu1 %v872_v0 }
  0x74   : > { %p804_p12 = por %p803_p9, %p802_p7 }
  0x76   : > { %631 = vmatpush3.bf16.msra.mxu1 %v630_v17  ;;  %p805_p2 = pnand %p804_p12, %p798_p3 }
  0x77   : > { %632 = vmatprep.subr.bf16.mxu1 %v872_v0 }
  0x7a   : > { %634 = vmatpush3.bf16.msra.mxu1 %v633_v20 }
 0x146   : > { %v351_v22 = vpop.f32.mrb[0].mxu0 }
 0x147   : > { %v352_v23 = vadd.f32 %v565_v21, %v351_v22  ;;  %v597_v24 = vpop.f32.mrb[1].mxu0 }
 0x149   : > { %v356_v25 = vmul.f32 0.70710677, %v352_v23  ;;  %v355_v27 = vmul.f32 0.5, %v352_v23 }
 0x14b   : > { %707 = verf.f32 %v356_v25 }
 0x155   : > { %v708_v26 = vpop.eup %707 }
 0x156   : > { %v358_v28 = vadd.f32 1.0, %v708_v26 }
 0x158   : > { %v359_v29 = vmul.f32 %v358_v28, %v355_v27 }
 0x15a   : > { %615 = vmatmul.mubr.msk.f32.vlgmr.msra.gmra.mrb[0].mxu1 %vm375_vm2, %v359_v29 }
 0x22d   : > { %v445_v31 = vpop.f32.mrb[0].mxu1 }
 0x22e   : > { %v446_v32 = vadd.f32 %v567_v30, %v445_v31  ;;  %v616_v33 = vpop.f32.mrb[1].mxu1 }
 0x230   : > { %449 = vst [vmem:[%s268_s28] sm:$0xff] %v446_v32 }
 0x231   : > { %808 = shalt.err (!%p805_p2)
}
 0x232   : > { %s809_s12 = scalar_lea.hbm %s1101_s15, 128  ;;  %s813_s26 = scalar_lea.hbm %s1150_s5, 256 }
 0x233   : > { %p810_p13 = scmp.ne.s32.totalorder %s1101_s15, %s809_s12  ;;  %p814_p4 = scmp.lt.u32.totalorder %s1101_s15, %s1150_s5 }
 0x234   : > { %p815_p5 = scmp.lt.u32.totalorder %s813_s26, %s809_s12  ;;  %p817_p11 = scmp.lt.u32.totalorder %s809_s12, %s1101_s15 }
 0x235   : > { %p811_p6 = pnand %p810_p13, %p1164_p0 }
 0x236   : > { %p816_p8 = por %p815_p5, %p814_p4 }
 0x237   : > { %p812_p10 = pneg %p811_p6 }
 0x238   : > { %p818_p1 = por %p817_p11, %p816_p8 }
 0x23a   : > { %p819_p3 = pnand %p818_p1, %p812_p10 }
 0x23c   : > { %822 = shalt.err (!%p819_p3)
}
 0x23d   : > { %645 = dma.vmem_to_hbm [thread:$0]  (%p1164_p0), %s1103_s7, 128, %s1101_s15, %s451_s16  }
 0x23e PF: > { %s476_s11 = sand.u32 1, %s853_s18   ;;  %p1165_p7 = scmp.ne.s32.totalorder %s1155_s25, 0 }
 0x23f   : > { %p1166_p9 = scmp.ge.s32.totalorder %s865_s21, 2  ;;  %s477_s28 = scalar_lea.sflag [#allocation4], %s476_s11 }
 0x241   : > { %p659_p12 = pnand %p1166_p9, %p1165_p7 }
 0x243   : > { %848 = dma.done.wait (!%p659_p12), %s477_s28, 128  }
 0x244   : > { %850 = vsyncadd (!%p659_p12), %s477_s28, 4294967168  ;;  %p19_p2 = scmp.ge.s32.totalorder %s1016_s14, 4   ;;  %s1167_s18 = smov %s857_s19 }
 0x245   : > { %s1168_s19 = smov %s861_s20  ;;  %s1169_s20 = smov %s1032_s27 }
 0x246   : > { %s1170_s21 = smov %s1016_s14  ;;  %21 = sbr.rel (!%p19_p2) target bundleno = 6 (0x6), region = 93 }
 0x24d   :  { %482 = vsyncpa [#allocation3], 1 }
 0x24e   :  { %484 = vsyncpa [#allocation3 + $0x1], 1 }
 0x24f   :  { %485 = vsyncpa [#allocation6], 1 }
 0x250   :  { %486 = vsyncpa [#allocation4], 1 }
 0x251   :  { %488 = vsyncpa [#allocation4 + $0x1], 1 }

</bundles_post_ra>
